<compile_context>
chip_gen: v6e
topology: v6e:2x2x1
jax: 0.10.0
libtpu: 0.0.40
codegen_flags: <defaults>
</compile_context>

<pallas_src>
import functools

import numpy as np

import jax
import jax.numpy as jnp
from jax import lax
from jax.experimental import pallas as pl
from jax.experimental.pallas import tpu as pltpu


# ---------------------------------------------------------------------------
# pltpu.roll direction probe (runs once, cached; call eagerly, outside jit).
# ---------------------------------------------------------------------------
@functools.lru_cache(maxsize=1)
def _roll_is_forward():
    """Returns (lane_fwd, sub_fwd). True => pltpu.roll(x, n-1, axis)[i] == x[i+1]."""

    def probe(col_ref, row_ref, lane_ref, sub_ref):
        lane_ref[...] = pltpu.roll(col_ref[...], 127, axis=1)
        sub_ref[...] = pltpu.roll(row_ref[...], 7, axis=0)

    col = np.tile(np.arange(128, dtype=np.int32)[None, :], (8, 1))
    row = np.tile(np.arange(8, dtype=np.int32)[:, None], (1, 128))
    lane, sub = pl.pallas_call(
        probe,
        out_shape=(jax.ShapeDtypeStruct((8, 128), jnp.int32),
                   jax.ShapeDtypeStruct((8, 128), jnp.int32)),
    )(col, row)
    lane_val = int(np.asarray(lane)[0, 0])
    sub_val = int(np.asarray(sub)[0, 0])
    if lane_val not in (1, 127) or sub_val not in (1, 7):
        raise RuntimeError(f"unexpected pltpu.roll semantics: {lane_val}, {sub_val}")
    return lane_val == 1, sub_val == 1


def _build_masks(cascades, rg, w, lane_fwd, sub_fwd):
    """(cascades, rg, w) f32 weight masks for pyramid levels 1..cascades.

    Level k holds 2**(2**k) * 4**k (pyramid weight x inverse pooling factor; the
    1/numel of every L1-mean is deferred to a final scalar multiply) at the
    representative corner of each 2^k x 2^k pooling window, 0 elsewhere.  Which
    corner is representative depends on the hardware roll convention.
    """
    m = np.zeros((cascades, rg, w), np.float32)
    rows, cols = np.arange(rg), np.arange(w)
    for k in range(1, cascades + 1):
        p = 1 << k
        coef = float(2 ** (2 ** k)) * float(4 ** k)
        rsel = (rows % p) == (0 if sub_fwd else p - 1)
        csel = (cols % p) == (0 if lane_fwd else p - 1)
        m[k - 1] = coef * np.outer(rsel, csel).astype(np.float32)
    return jnp.asarray(m)


# ---------------------------------------------------------------------------
# Kernel
# ---------------------------------------------------------------------------
def _multi_mae_kernel(mask_ref, yp_ref, yt_ref, out_ref, acc_ref, *,
                      cascades, rg, bw, gb, gc, n_groups, nb_per_core,
                      has_tail, native_pool):
    i = pl.program_id(1)

    @pl.when(i == 0)
    def _init():
        acc_ref[...] = jnp.zeros_like(acc_ref)

    # Hoisted level masks: one VMEM read per grid step, not per group.
    mlist = [mask_ref[k] for k in range(cascades)]

    def pool(x, s):
        # One 2x2 max-pool step at stride s (1, 2, 4, ...).  The representative
        # corner of each window ends up holding the window max; every other
        # position is a don't-care value the masks zero out.
        xw = jnp.maximum(x, pltpu.roll(x, bw - s, axis=1))       # pair along W (lanes)
        return jnp.maximum(xw, pltpu.roll(xw, rg - s, axis=0))   # pair along H (sublanes)

    def group_contrib(idx):
        yp = yp_ref[idx]
        yt = yt_ref[idx]
        if not native_pool:                      # pyramid in f32 unless input is bf16
            yp = yp.astype(jnp.float32)
            yt = yt.astype(jnp.float32)
        # Level 0: weight is exactly 1 -> no mask multiply.
        contrib = jnp.abs(yp.astype(jnp.float32) - yt.astype(jnp.float32))
        pp, pt = yp, yt
        for k in range(1, cascades + 1):
            s = 1 << (k - 1)
            pp = pool(pp, s)
            pt = pool(pt, s)
            contrib = contrib + mlist[k - 1] * jnp.abs(
                pp.astype(jnp.float32) - pt.astype(jnp.float32))
        return contrib

    zeros = jnp.zeros((rg, bw), jnp.float32)
    n_chunks = gb // gc

    def full_chunk(c, local):
        base = pl.multiple_of(c * gc, gc)
        for g in range(gc):                      # tiny static unroll (gc <= 4)
            local = local + group_contrib(base + g)
        return local

    def run_full():
        if n_chunks == 1:
            local = full_chunk(0, zeros)
        else:
            local = lax.fori_loop(0, n_chunks, full_chunk, zeros)
        acc_ref[...] += local                    # single RMW per grid step

    if not has_tail:
        run_full()
    else:
        blk = pl.program_id(0) * nb_per_core + i
        n_valid = jnp.clip(n_groups - blk * gb, 0, gb)

        @pl.when(n_valid == gb)                  # hot path: full block, no masking
        def _full():
            run_full()

        @pl.when(jnp.logical_and(n_valid > 0, n_valid < gb))   # cold ragged tail
        def _tail():
            local = lax.fori_loop(0, n_valid,
                                  lambda g, l: l + group_contrib(g), zeros)
            acc_ref[...] += local

    @pl.when(i == pl.num_programs(1) - 1)
    def _finish():
        out_ref[0, 0] = jnp.sum(acc_ref[...])


# ---------------------------------------------------------------------------
# Wrapper
# ---------------------------------------------------------------------------
def multi_mae_loss(y_pre, y_true, cascades=3, *, block_bytes=4 * 1024 * 1024):
    if y_pre.shape != y_true.shape:
        raise ValueError("y_pre / y_true shape mismatch")
    if y_pre.dtype != y_true.dtype:
        raise ValueError("y_pre / y_true dtype mismatch")
    if y_pre.ndim not in (4, 5):
        raise ValueError("expected 4-D (B,C,H,W) or 5-D (B,S,C,H,W) inputs")
    if cascades < 1:
        raise ValueError("cascades must be >= 1")

    H, W = y_pre.shape[-2], y_pre.shape[-1]
    itemsize = jnp.dtype(y_pre.dtype).itemsize
    native_pool = y_pre.dtype == jnp.bfloat16    # keep the max-pool pyramid in bf16

    # Row-group height: every 2^k x 2^k pooling window must live inside one group,
    # and the group should fill the native sublane tile (16 rows for 2-byte dtypes).
    rg = max(8, 1 << cascades)
    if itemsize == 2 and H % max(16, rg) == 0:
        rg = max(16, rg)
    if H % rg != 0 or W % (1 << cascades) != 0:
        # TODO(synk): PyTorch MaxPool2d floors odd spatial dims; that tail case is not
        # handled here -- H must be a multiple of rg and W a multiple of 2**cascades.
        raise ValueError(f"need H % {rg} == 0 and W % {1 << cascades} == 0, got {H}x{W}")

    numel = int(np.prod(y_pre.shape))
    lane_fwd, sub_fwd = _roll_is_forward()       # resolve roll convention once (eager)
    masks = _build_masks(cascades, rg, W, lane_fwd, sub_fwd)

    # Copy-free reshape: (..., H, W) -> (G, rg, W); each group is rg consecutive
    # rows of one image, so pooling never crosses a group boundary.
    x_pre = y_pre.reshape(-1, rg, W)
    x_true = y_true.reshape(-1, rg, W)
    G = x_pre.shape[0]

    # --- cdiv-based tiling (no exact-divisor requirement) -----------------------
    group_bytes = rg * W * itemsize
    gb = max(1, min(G, block_bytes // group_bytes))   # groups per grid block
    gc = max(1, min(4, gb))                           # groups per unrolled chunk
    gb = (gb // gc) * gc
    n_blocks = pl.cdiv(G, gb)

    P = 2 if n_blocks >= 2 else 1                     # per-core partial sums
    NB = pl.cdiv(n_blocks, P)
    has_tail = (G != n_blocks * gb) or (n_blocks != P * NB)

    if has_tail:
        def in_map(p, i):
            # Clamp so the DMA always stays in range; the kernel skips the
            # out-of-range / ragged groups via n_valid.
            return (jnp.minimum(p * NB + i, n_blocks - 1), 0, 0)
    else:
        def in_map(p, i):
            return (p * NB + i, 0, 0)

    kernel = functools.partial(
        _multi_mae_kernel, cascades=cascades, rg=rg, bw=W, gb=gb, gc=gc,
        n_groups=G, nb_per_core=NB, has_tail=has_tail, native_pool=native_pool)

    in_block_bytes = 2 * 2 * gb * group_bytes         # 2 inputs x double buffering
    vmem_limit = int(min(100 << 20, max(32 << 20, in_block_bytes + (4 << 20))))

    cost = pl.CostEstimate(
        flops=28 * numel,
        transcendentals=0,
        bytes_accessed=2 * numel * itemsize + int(masks.size) * 4)

    partials = pl.pallas_call(
        kernel,
        out_shape=jax.ShapeDtypeStruct((P, 1), jnp.float32),
        grid=(P, NB),
        in_specs=[
            pl.BlockSpec((cascades, rg, W), lambda p, i: (0, 0, 0)),
            pl.BlockSpec((gb, rg, W), in_map),
            pl.BlockSpec((gb, rg, W), in_map),
        ],
        out_specs=pl.BlockSpec((1, 1), lambda p, i: (p, 0),
                               memory_space=pltpu.SMEM),
        scratch_shapes=[pltpu.VMEM((rg, W), jnp.float32)],
        compiler_params=pltpu.CompilerParams(
            dimension_semantics=("parallel", "arbitrary"),
            vmem_limit_bytes=vmem_limit),
        cost_estimate=cost,
    )(masks, x_pre, x_true)

    # 1/numel of every per-level mean applied once here (exact power-of-two level
    # weights stay in the masks, so only this one divide rounds).
    return jnp.sum(partials) * (1.0 / numel)


# ---------------------------------------------------------------------------
# Pure-JAX reference mirroring the PyTorch module exactly.
# ---------------------------------------------------------------------------
def _maxpool2x2(x):
    n, c, h, w = x.shape
    return jnp.max(x.reshape(n, c, h // 2, 2, w // 2, 2), axis=(3, 5))


def multi_mae_loss_ref(y_pre, y_true, cascades=3):
    if y_pre.ndim == 5:
        b, s, c, h, w = y_pre.shape
        y_pre = y_pre.reshape(b, s * c, h, w)
        y_true = y_true.reshape(b, s * c, h, w)
    y_pre = y_pre.astype(jnp.float32)
    y_true = y_true.astype(jnp.float32)
    loss = jnp.mean(jnp.abs(y_pre - y_true))
    for i in range(cascades):
        y_pre = _maxpool2x2(y_pre)
        y_true = _maxpool2x2(y_true)
        loss = loss + (2.0 ** (2 ** (i + 1))) * jnp.mean(jnp.abs(y_pre - y_true))
    return loss


if __name__ == "__main__":
    key = jax.random.PRNGKey(0)
    ks = jax.random.split(key, 6)

    _roll_is_forward()   # warm the roll-direction probe eagerly (outside any jit)

    # 1) f32 NCHW, default large-block single-grid-step path.
    y_true = jax.random.uniform(ks[0], (2, 4, 16, 128), jnp.float32)
    y_pre = jax.random.uniform(ks[1], (2, 4, 16, 128), jnp.float32)
    out = jax.block_until_ready(multi_mae_loss(y_pre, y_true))
    ref = jax.block_until_ready(multi_mae_loss_ref(y_pre, y_true))
    assert jnp.allclose(out, ref, rtol=2e-4, atol=1e-5), (out, ref)

    # 2) f32 5-D NSCHW with forced-small blocks: multi-block grid, dual-core split,
    #    a ragged tail block and one fully out-of-range (clamped) block.
    y_true5 = jax.random.uniform(ks[2], (2, 3, 1, 24, 128), jnp.float32)
    y_pre5 = jax.random.uniform(ks[3], (2, 3, 1, 24, 128), jnp.float32)
    out5 = jax.block_until_ready(multi_mae_loss(y_pre5, y_true5, block_bytes=16 * 1024))
    ref5 = jax.block_until_ready(multi_mae_loss_ref(y_pre5, y_true5))
    assert jnp.allclose(out5, ref5, rtol=2e-4, atol=1e-5), (out5, ref5)

    # 3) bf16 NCHW: pyramid kept in bf16 with 16-row groups.
    y_trueb = jax.random.uniform(ks[4], (2, 2, 32, 128), jnp.float32).astype(jnp.bfloat16)
    y_preb = jax.random.uniform(ks[5], (2, 2, 32, 128), jnp.float32).astype(jnp.bfloat16)
    outb = jax.block_until_ready(multi_mae_loss(y_preb, y_trueb))
    refb = jax.block_until_ready(multi_mae_loss_ref(y_preb, y_trueb))
    assert jnp.allclose(outb, refb, rtol=2e-4, atol=1e-5), (outb, refb)

    print("KERNEL_OK")
</pallas_src>

<mosaic_0001>
module attributes {stable_mosaic.version = 11 : i64} {
  func.func @probe(%arg0: memref<8x128xi32, #tpu.memory_space<vmem>>, %arg1: memref<8x128xi32, #tpu.memory_space<vmem>>, %arg2: memref<8x128xi32, #tpu.memory_space<vmem>>, %arg3: memref<8x128xi32, #tpu.memory_space<vmem>>) attributes {dimension_semantics = [], scalar_prefetch = 0 : i64, scratch_operands = 0 : i64, tpu.core_type = #tpu.core_type<tc>} {
    %c0 = arith.constant 0 : index
    %c0_0 = arith.constant 0 : index
    %0 = vector.load %arg0[%c0, %c0_0] : memref<8x128xi32, #tpu.memory_space<vmem>>, vector<8x128xi32>
    %c127_i32 = arith.constant 127 : i32
    %1 = tpu.dynamic_rotate %0 by %c127_i32 dim 1 : vector<8x128xi32>, i32 -> vector<8x128xi32>
    %c0_1 = arith.constant 0 : index
    %c0_2 = arith.constant 0 : index
    %2 = vector.load %arg2[%c0_1, %c0_2] : memref<8x128xi32, #tpu.memory_space<vmem>>, vector<8x128xi32>
    tpu.vector_store %arg2[%c0_1, %c0_2], %1 {strides = array<i32>} : memref<8x128xi32, #tpu.memory_space<vmem>>, vector<8x128xi32>,
    %c0_3 = arith.constant 0 : index
    %c0_4 = arith.constant 0 : index
    %3 = vector.load %arg1[%c0_3, %c0_4] : memref<8x128xi32, #tpu.memory_space<vmem>>, vector<8x128xi32>
    %c7_i32 = arith.constant 7 : i32
    %4 = tpu.dynamic_rotate %3 by %c7_i32 dim 0 : vector<8x128xi32>, i32 -> vector<8x128xi32>
    %c0_5 = arith.constant 0 : index
    %c0_6 = arith.constant 0 : index
    %5 = vector.load %arg3[%c0_5, %c0_6] : memref<8x128xi32, #tpu.memory_space<vmem>>, vector<8x128xi32>
    tpu.vector_store %arg3[%c0_5, %c0_6], %4 {strides = array<i32>} : memref<8x128xi32, #tpu.memory_space<vmem>>, vector<8x128xi32>,
    return
  }
}

</mosaic_0001>

<bundles_post_ra>
// kernel: tpu_custom_call.1
= control target key start
LH: loop header
LB: loop body
LE: loop exit
PB: predicated region body
PF: predicated region fallthrough
CT: control target
= control target key end

     0   :  { %9 = vsyncpa [#allocation3], 0  ;;  %s206_s0 = inlined_call_operand.hbm [shape: s32[8,128], index: 0, kind: input, shape index: {}]   ;;  %s207_s1 = inlined_call_operand.hbm [shape: s32[8,128], index: 1, kind: input, shape index: {}]   ;;  %s208_s2 = inlined_call_operand.hbm [shape: s32[8,128], index: 2, kind: output, shape index: {0}]   ;;  %s209_s3 = inlined_call_operand.hbm [shape: s32[8,128], index: 3, kind: output, shape index: {1}]  }
   0x1   :  { %10 = vsyncpa [#allocation6], 0 }
   0x2   :  { %11 = vsyncpa [#allocation4], 0 }
   0x3   :  { %12 = vsyncpa [#allocation9], 0  ;;  %s169_s12 = smov [#allocation2]   ;;  %s170_s14 = smov [#allocation5]  }
   0x4   :  { %s19_s13 = sshll.u32 %s169_s12, 4  ;;  %s29_s15 = sshll.u32 %s170_s14, 4  ;;  %s20_s13 = int_to_ptr.vmem [resolvable:$true] %s19_s13  ;;  %s30_s15 = int_to_ptr.vmem [resolvable:$true] %s29_s15 }
   0x5   :  { %s89_s16 = scalar_lea.vmem %s20_s13, 128  ;;  %p94_p1 = scmp.lt.s32.totalorder %s20_s13, %s20_s13 }
   0x6   :  { %p90_p0 = scmp.ne.s32.totalorder %s20_s13, %s89_s16  ;;  %p95_p2 = scmp.lt.s32.totalorder %s89_s16, %s89_s16 }
   0x8   :  { %p96_p3 = por %p95_p2, %p94_p1 }
   0xa   :  { %p97_p4 = pnand %p96_p3, %p90_p0 }
   0xc   :  { %100 = shalt.err (!%p97_p4)
}
   0xd   :  { %22 = dma.hbm_to_vmem [thread:$0]  %s206_s0, 128, %s20_s13, [#allocation3]  }
   0xe   :  { %s109_s19 = scalar_lea.vmem %s30_s15, 128  ;;  %p114_p6 = scmp.lt.s32.totalorder %s30_s15, %s30_s15 }
   0xf   :  { %p110_p5 = scmp.ne.s32.totalorder %s30_s15, %s109_s19  ;;  %p115_p7 = scmp.lt.s32.totalorder %s109_s19, %s109_s19 }
  0x11   :  { %p116_p8 = por %p115_p7, %p114_p6 }
  0x13   :  { %p117_p9 = pnand %p116_p8, %p110_p5 }
  0x15   :  { %120 = shalt.err (!%p117_p9)
}
  0x16   :  { %32 = dma.hbm_to_vmem [thread:$0]  %s207_s1, 128, %s30_s15, [#allocation6]  }
  0x17   :  { %161 = dma.done.wait [#allocation3], 128  }
  0x18   :  { %162 = vsyncadd [#allocation3], 4294967168 }
  0x19   :  { %163 = dma.done.wait [#allocation6], 128  }
  0x1a   :  { %164 = vsyncadd [#allocation6], 4294967168  ;;  %s171_s22 = smov [#allocation8]   ;;  %v39_v0 = vld [vmem:[#allocation2] sm:$0xff]  ;;  %v43_v1 = vld [vmem:[#allocation5] sm:$0xff]  ;;  %s172_s0 = smov 127  }
  0x1b   :  { %s62_s23 = sshll.u32 %s171_s22, 4  ;;  %40 = vrot.lane.b32.xlu0 %v39_v0, %s172_s0  ;;  %v44_v2 = vrot.slane %v43_v1, 1  ;;  %s63_s23 = int_to_ptr.vmem [resolvable:$true] %s62_s23 }
  0x1c   :  { %s121_s24 = scalar_lea.vmem %s63_s23, 128  ;;  %p126_p11 = scmp.lt.s32.totalorder %s63_s23, %s63_s23 }
  0x1d   :  { %45 = vst [vmem:[#allocation8] sm:$0xff] %v44_v2  ;;  %p122_p10 = scmp.ne.s32.totalorder %s63_s23, %s121_s24  ;;  %p127_p12 = scmp.lt.s32.totalorder %s121_s24, %s121_s24 }
  0x1f   :  { %p128_p13 = por %p127_p12, %p126_p11 }
  0x21   :  { %p129_p0 = pnand %p128_p13, %p122_p10 }
  0x23   :  { %132 = shalt.err (!%p129_p0)
}
  0x24   :  { %65 = dma.vmem_to_hbm [thread:$0]  %s63_s23, 128, %s209_s3, [#allocation9]  }
  0x25   :  { %s173_s26 = smov [#allocation7]  }
  0x26   :  { %s52_s27 = sshll.u32 %s173_s26, 4  ;;  %s53_s27 = int_to_ptr.vmem [resolvable:$true] %s52_s27 }
  0x27   :  { %s141_s28 = scalar_lea.vmem %s53_s27, 128  ;;  %p146_p2 = scmp.lt.s32.totalorder %s53_s27, %s53_s27 }
  0x28   :  { %p142_p1 = scmp.ne.s32.totalorder %s53_s27, %s141_s28  ;;  %p147_p3 = scmp.lt.s32.totalorder %s141_s28, %s141_s28 }
  0x2a   :  { %p148_p4 = por %p147_p3, %p146_p2 }
  0x2c   :  { %p149_p5 = pnand %p148_p4, %p142_p1 }
  0x8d   :  { %v41_v3 = vpop.permute.xlu0 %40 }
  0x8e   :  { %42 = vst [vmem:[#allocation7] sm:$0xff] %v41_v3 }
  0x8f   :  { %152 = shalt.err (!%p149_p5)
}
  0x90   :  { %55 = dma.vmem_to_hbm [thread:$0]  %s53_s27, 128, %s208_s2, [#allocation4]  }
  0x91   :  { %165 = dma.done.wait [#allocation4], 128  }
  0x92   :  { %166 = vsyncadd [#allocation4], 4294967168 }
  0x93   :  { %167 = dma.done.wait [#allocation9], 128  }
  0x94   :  { %168 = vsyncadd [#allocation9], 4294967168 }
  0x95   :  { %72 = vsyncpa [#allocation3], 1 }
  0x96   :  { %73 = vsyncpa [#allocation6], 1 }
  0x97   :  { %74 = vsyncpa [#allocation4], 1 }
  0x98   :  { %75 = vsyncpa [#allocation9], 1 }

</bundles_post_ra>
